<compile_context>
chip_gen: v6e
topology: v6e:2x2x1
jax: 0.10.0
libtpu: 0.0.40
codegen_flags: <defaults>
</compile_context>

<pallas_src>
import functools

import jax
import jax.numpy as jnp
import numpy as np
from jax import lax
from jax.experimental import pallas as pl
from jax.experimental.pallas import tpu as pltpu


# ----------------------------------------------------------------------------
# helpers
# ----------------------------------------------------------------------------
def _round_up(x, m):
    return ((x + m - 1) // m) * m


def _pick_tk(k):
    # Reduction tiles must exactly divide K (OOB reads on a contraction axis
    # would corrupt valid outputs).  All K here are multiples of 128.
    for tk in (512, 384, 256, 128):
        if k % tk == 0:
            return tk
    return k


def fold_bn(gamma, beta, mean, var, eps=1e-5):
    scale = gamma / jnp.sqrt(var + eps)
    bias = beta - mean * scale
    return scale, bias


# ----------------------------------------------------------------------------
# Fused matmul kernel: out = [relu]( x @ w + bias [+ residual] )
# (BN scale is pre-folded into w; bf16 MXU inputs, f32 accumulate/epilogue.)
# ----------------------------------------------------------------------------
def _matmul_bn_kernel(x_ref, w_ref, b_ref, *rest, apply_relu, add_residual):
    if add_residual:
        res_ref, o_ref, acc_ref = rest
    else:
        o_ref, acc_ref = rest
    k = pl.program_id(2)

    @pl.when(k == 0)
    def _init():
        acc_ref[...] = jnp.zeros_like(acc_ref)

    acc_ref[...] += jnp.dot(x_ref[...], w_ref[...],
                            preferred_element_type=jnp.float32)

    @pl.when(k == pl.num_programs(2) - 1)
    def _finalize():
        acc = acc_ref[...] + b_ref[...]
        if add_residual:
            acc = acc + res_ref[...].astype(jnp.float32)
        if apply_relu:
            acc = jnp.maximum(acc, 0.0)
        o_ref[...] = acc.astype(o_ref.dtype)


def fused_matmul_bn(x, w, bias, residual=None, apply_relu=True,
                    out_dtype=jnp.bfloat16):
    """x: (M, K), w: (K, N) (BN-scale folded), bias: (N,), residual: (M, N)."""
    M, K = x.shape
    K2, N = w.shape
    assert K == K2
    tm = min(512, _round_up(M, 8))
    tn = min(512, N)
    tk = _pick_tk(K)
    grid = (pl.cdiv(M, tm), pl.cdiv(N, tn), K // tk)

    x = x.astype(jnp.bfloat16)
    w = w.astype(jnp.bfloat16)
    bias2 = bias.reshape(1, N).astype(jnp.float32)

    in_specs = [
        pl.BlockSpec((tm, tk), lambda i, j, k: (i, k)),
        pl.BlockSpec((tk, tn), lambda i, j, k: (k, j)),
        pl.BlockSpec((1, tn), lambda i, j, k: (0, j)),
    ]
    args = [x, w, bias2]
    add_residual = residual is not None
    if add_residual:
        # residual is passed in its storage dtype; cast to f32 inside the kernel.
        in_specs.append(pl.BlockSpec((tm, tn), lambda i, j, k: (i, j)))
        args.append(residual)

    kernel = functools.partial(_matmul_bn_kernel,
                               apply_relu=apply_relu,
                               add_residual=add_residual)
    return pl.pallas_call(
        kernel,
        out_shape=jax.ShapeDtypeStruct((M, N), out_dtype),
        grid=grid,
        in_specs=in_specs,
        out_specs=pl.BlockSpec((tm, tn), lambda i, j, k: (i, j)),
        scratch_shapes=[pltpu.VMEM((tm, tn), jnp.float32)],
        compiler_params=pltpu.CompilerParams(
            dimension_semantics=("parallel", "parallel", "arbitrary"),
            vmem_limit_bytes=32 * 1024 * 1024),
    )(*args)


# ----------------------------------------------------------------------------
# Fused 3x3 / stride-1 / pad-1 conv + BN + ReLU (halo kernel, no HBM im2col).
# One grid step = one image: the padded image is DMA'd to VMEM once and the
# nine taps are sliced in-kernel and accumulated in f32.
# ----------------------------------------------------------------------------
def _conv3x3_bn_kernel(x_ref, w_ref, b_ref, o_ref):
    # x_ref: (1, H+2, W+2, Ci) bf16, w_ref: (9, Ci, Co) bf16 (scale folded)
    # b_ref: (1, Co) f32, o_ref: (1, Ho, Wo, Co)
    _, Ho, Wo, Co = o_ref.shape
    Ci = x_ref.shape[-1]
    acc = jnp.zeros((Ho * Wo, Co), jnp.float32)
    for dy in range(3):
        for dx in range(3):
            x_tap = x_ref[0, dy:dy + Ho, dx:dx + Wo, :]      # (Ho, Wo, Ci)
            x2 = x_tap.reshape(Ho * Wo, Ci)
            acc = acc + jnp.dot(x2, w_ref[dy * 3 + dx],
                                preferred_element_type=jnp.float32)
    acc = jnp.maximum(acc + b_ref[...], 0.0)
    o_ref[...] = acc.reshape(1, Ho, Wo, Co).astype(o_ref.dtype)


def fused_conv3x3_bn_relu(x_nhwc, w_hwio, bias):
    """stride-1, pad-1 3x3 conv + folded BN + ReLU. x: (N,H,W,Ci) bf16."""
    N, H, W, Ci = x_nhwc.shape
    Co = w_hwio.shape[-1]
    xp = jnp.pad(x_nhwc, ((0, 0), (1, 1), (1, 1), (0, 0)))
    w9 = w_hwio.reshape(9, Ci, Co).astype(jnp.bfloat16)
    b2 = bias.reshape(1, Co).astype(jnp.float32)
    return pl.pallas_call(
        _conv3x3_bn_kernel,
        out_shape=jax.ShapeDtypeStruct((N, H, W, Co), jnp.bfloat16),
        grid=(N,),
        in_specs=[
            pl.BlockSpec((1, H + 2, W + 2, Ci), lambda n: (n, 0, 0, 0)),
            pl.BlockSpec((9, Ci, Co), lambda n: (0, 0, 0)),
            pl.BlockSpec((1, Co), lambda n: (0, 0)),
        ],
        out_specs=pl.BlockSpec((1, H, W, Co), lambda n: (n, 0, 0, 0)),
        compiler_params=pltpu.CompilerParams(
            dimension_semantics=("parallel",),
            vmem_limit_bytes=32 * 1024 * 1024),
    )(xp, w9, b2)


# ----------------------------------------------------------------------------
# im2col fallback for stride > 1 (pure XLA data movement, rare path).
# ----------------------------------------------------------------------------
def im2col_3x3(x_nhwc, stride):
    N, H, W, C = x_nhwc.shape
    xp = jnp.pad(x_nhwc, ((0, 0), (1, 1), (1, 1), (0, 0)))
    Ho = (H + 2 - 3) // stride + 1
    Wo = (W + 2 - 3) // stride + 1
    cols = []
    for dy in range(3):
        for dx in range(3):
            sl = xp[:, dy:dy + (Ho - 1) * stride + 1:stride,
                      dx:dx + (Wo - 1) * stride + 1:stride, :]
            cols.append(sl)
    patches = jnp.concatenate(cols, axis=-1)  # (N, Ho, Wo, 9*C), (kh,kw,cin)
    return patches.reshape(N * Ho * Wo, 9 * C), Ho, Wo


# ----------------------------------------------------------------------------
# Weight / BN preparation (trace-time XLA: fold BN scale, pad channels to 128).
# ----------------------------------------------------------------------------
def _prep_1x1(w_oihw, bn, ci_p, co_p):
    co, ci = w_oihw.shape[:2]
    s, b = fold_bn(*bn)
    wm = jnp.transpose(w_oihw[:, :, 0, 0], (1, 0)) * s[None, :]   # (Ci, Co)
    wm = jnp.pad(wm, ((0, ci_p - ci), (0, co_p - co)))
    b = jnp.pad(b, (0, co_p - co))
    return wm.astype(jnp.bfloat16), b.astype(jnp.float32)


def _prep_3x3(w_oihw, bn, ci_p, co_p):
    co, ci = w_oihw.shape[:2]
    s, b = fold_bn(*bn)
    w_hwio = jnp.transpose(w_oihw, (2, 3, 1, 0)) * s[None, None, None, :]
    w_hwio = jnp.pad(w_hwio, ((0, 0), (0, 0), (0, ci_p - ci), (0, co_p - co)))
    b = jnp.pad(b, (0, co_p - co))
    return w_hwio.astype(jnp.bfloat16), b.astype(jnp.float32)


# ----------------------------------------------------------------------------
# Bottleneck forward (Pallas hot path).  NHWC inside; when chaining blocks use
# bottleneck_forward_nhwc directly to avoid per-block layout transposes.
# ----------------------------------------------------------------------------
def bottleneck_forward_nhwc(x, params, stride=1, has_downsample=False):
    N, H, W, Cin = x.shape
    planes = params["w1"].shape[0]
    Cout = params["w3"].shape[0]          # planes * expansion
    cin_p = _round_up(Cin, 128)
    p_p = _round_up(planes, 128)
    cout_p = _round_up(Cout, 128)

    x = jnp.pad(x, ((0, 0), (0, 0), (0, 0), (0, cin_p - Cin)))   # lane-dense
    x_mat = x.reshape(N * H * W, cin_p)

    # conv1 (1x1) + bn1 + relu
    w1m, b1 = _prep_1x1(params["w1"], params["bn1"], cin_p, p_p)
    out1 = fused_matmul_bn(x_mat, w1m, b1, apply_relu=True)       # bf16

    # conv2 (3x3, pad=1) + bn2 + relu
    w2m, b2 = _prep_3x3(params["w2"], params["bn2"], p_p, p_p)
    out1_4d = out1.reshape(N, H, W, p_p)
    if stride == 1:
        out2_4d = fused_conv3x3_bn_relu(out1_4d, w2m, b2)
        Ho, Wo = H, W
        out2 = out2_4d.reshape(N * Ho * Wo, p_p)
    else:
        # TODO(synk): strided 3x3 conv still uses an XLA im2col; only the
        # stride-1 case is fused into the halo Pallas kernel.
        patches, Ho, Wo = im2col_3x3(out1_4d, stride)
        out2 = fused_matmul_bn(patches, w2m.reshape(9 * p_p, p_p), b2,
                               apply_relu=True)

    # residual branch
    if has_downsample:
        xs = x[:, ::stride, ::stride, :].reshape(N * Ho * Wo, cin_p)
        wdm, bd = _prep_1x1(params["wd"], params["bnd"], cin_p, cout_p)
        residual = fused_matmul_bn(xs, wdm, bd, apply_relu=False)
    else:
        assert stride == 1 and Cin == Cout
        residual = x_mat   # f32, same channel padding since Cin == Cout

    # conv3 (1x1) + bn3 + residual add + relu (single fused kernel)
    w3m, b3 = _prep_1x1(params["w3"], params["bn3"], p_p, cout_p)
    out = fused_matmul_bn(out2, w3m, b3, residual=residual,
                          apply_relu=True, out_dtype=jnp.float32)

    out = out.reshape(N, Ho, Wo, cout_p)[..., :Cout]
    return out


def bottleneck_forward(x_nchw, params, stride=1, has_downsample=False):
    x = jnp.transpose(x_nchw, (0, 2, 3, 1))
    out = bottleneck_forward_nhwc(x, params, stride, has_downsample)
    return jnp.transpose(out, (0, 3, 1, 2))


# ----------------------------------------------------------------------------
# Pure-JAX reference (mirrors the PyTorch forward, inference-mode BN, f32).
# ----------------------------------------------------------------------------
def _conv_nchw(x, w, stride=1, padding=0):
    return lax.conv_general_dilated(
        x, w, (stride, stride), [(padding, padding)] * 2,
        dimension_numbers=("NCHW", "OIHW", "NCHW"))


def _bn_nchw(x, bn, eps=1e-5):
    gamma, beta, mean, var = bn
    s = gamma / jnp.sqrt(var + eps)
    b = beta - mean * s
    return x * s[None, :, None, None] + b[None, :, None, None]


def bottleneck_reference(x, params, stride=1, has_downsample=False):
    residual = x
    out = _conv_nchw(x, params["w1"])
    out = jnp.maximum(_bn_nchw(out, params["bn1"]), 0.0)
    out = _conv_nchw(out, params["w2"], stride=stride, padding=1)
    out = jnp.maximum(_bn_nchw(out, params["bn2"]), 0.0)
    out = _conv_nchw(out, params["w3"])
    out = _bn_nchw(out, params["bn3"])
    if has_downsample:
        residual = _bn_nchw(_conv_nchw(x, params["wd"], stride=stride),
                            params["bnd"])
    return jnp.maximum(out + residual, 0.0)


# ----------------------------------------------------------------------------
# Deterministic parameter construction (shapes from Bottleneck.__init__).
# ----------------------------------------------------------------------------
def make_params(key, inplanes, planes, has_downsample=False):
    expansion = 4
    ks = jax.random.split(key, 16)

    def bn(k, c):
        k1, k2, k3, k4 = jax.random.split(k, 4)
        gamma = 1.0 + 0.1 * jax.random.normal(k1, (c,), jnp.float32)
        beta = 0.1 * jax.random.normal(k2, (c,), jnp.float32)
        mean = 0.1 * jax.random.normal(k3, (c,), jnp.float32)
        var = jax.random.uniform(k4, (c,), jnp.float32, 0.5, 1.5)
        return (gamma, beta, mean, var)

    p = {
        "w1": 0.1 * jax.random.normal(ks[0], (planes, inplanes, 1, 1), jnp.float32),
        "bn1": bn(ks[1], planes),
        "w2": 0.1 * jax.random.normal(ks[2], (planes, planes, 3, 3), jnp.float32),
        "bn2": bn(ks[3], planes),
        "w3": 0.1 * jax.random.normal(ks[4], (planes * expansion, planes, 1, 1), jnp.float32),
        "bn3": bn(ks[5], planes * expansion),
    }
    if has_downsample:
        p["wd"] = 0.1 * jax.random.normal(
            ks[6], (planes * expansion, inplanes, 1, 1), jnp.float32)
        p["bnd"] = bn(ks[7], planes * expansion)
    return p


if __name__ == "__main__":
    key = jax.random.PRNGKey(0)
    kx, kp, kx2, kp2 = jax.random.split(key, 4)

    # Config A: identity residual (inplanes == planes*4, stride=1) — exercises
    # the fused halo 3x3 kernel and the fused residual-add matmul.
    batch, planes, spatial = 2, 4, 8
    inplanes = planes * 4  # 16
    x = jax.random.normal(kx, (batch, inplanes, spatial, spatial), jnp.float32)
    params = make_params(kp, inplanes, planes, has_downsample=False)
    out = jax.block_until_ready(
        bottleneck_forward(x, params, stride=1, has_downsample=False))
    ref = jax.block_until_ready(
        bottleneck_reference(x, params, stride=1, has_downsample=False))
    assert out.shape == (batch, planes * 4, spatial, spatial)
    np.testing.assert_allclose(np.asarray(out), np.asarray(ref),
                               rtol=2e-2, atol=2e-2)

    # Config B: downsample residual with stride=2 — exercises the downsample
    # matmul and the strided im2col fallback.
    inplanes_b = 8
    x2 = jax.random.normal(kx2, (batch, inplanes_b, spatial, spatial), jnp.float32)
    params_b = make_params(kp2, inplanes_b, planes, has_downsample=True)
    out2 = jax.block_until_ready(
        bottleneck_forward(x2, params_b, stride=2, has_downsample=True))
    ref2 = jax.block_until_ready(
        bottleneck_reference(x2, params_b, stride=2, has_downsample=True))
    assert out2.shape == (batch, planes * 4, spatial // 2, spatial // 2)
    np.testing.assert_allclose(np.asarray(out2), np.asarray(ref2),
                               rtol=2e-2, atol=2e-2)

    print("KERNEL_OK")
</pallas_src>

<mosaic_0001>
module attributes {stable_mosaic.version = 11 : i64} {
  func.func @_matmul_bn_kernel(%arg0: i32, %arg1: i32, %arg2: i32, %arg3: memref<128x128xbf16, #tpu.memory_space<vmem>>, %arg4: memref<128x128xbf16, #tpu.memory_space<vmem>>, %arg5: memref<1x128xf32, #tpu.memory_space<vmem>>, %arg6: memref<128x128xbf16, #tpu.memory_space<vmem>>, %arg7: memref<128x128xf32, #tpu.memory_space<vmem>>) attributes {dimension_semantics = [#tpu.dimension_semantics<parallel>, #tpu.dimension_semantics<parallel>, #tpu.dimension_semantics<arbitrary>], iteration_bounds = array<i64: 1, 1, 1>, scalar_prefetch = 0 : i64, scratch_operands = 1 : i64, tpu.core_type = #tpu.core_type<tc>, window_params = [{transform_indices = @transform_0, window_bounds = array<i64: 128, 128>}, {transform_indices = @transform_1, window_bounds = array<i64: 128, 128>}, {transform_indices = @transform_2, window_bounds = array<i64: 1, 128>}, {transform_indices = @transform_3, window_bounds = array<i64: 128, 128>}]} {
    %c0_i32 = arith.constant 0 : i32
    %0 = arith.cmpi eq, %arg2, %c0_i32 : i32
    %1 = arith.extui %0 : i1 to i32
    %c0_i32_0 = arith.constant 0 : i32
    %2 = arith.cmpi ne, %1, %c0_i32_0 : i32
    scf.if %2 {
      %cst_10 = arith.constant 0.000000e+00 : f32
      %12 = vector.broadcast %cst_10 : f32 to vector<128x128xf32>
      %c0_11 = arith.constant 0 : index
      %c0_12 = arith.constant 0 : index
      %13 = vector.load %arg7[%c0_11, %c0_12] : memref<128x128xf32, #tpu.memory_space<vmem>>, vector<128x128xf32>
      tpu.vector_store %arg7[%c0_11, %c0_12], %12 {strides = array<i32>} : memref<128x128xf32, #tpu.memory_space<vmem>>, vector<128x128xf32>,
    } else {
    }
    %c0 = arith.constant 0 : index
    %c0_1 = arith.constant 0 : index
    %3 = vector.load %arg7[%c0, %c0_1] : memref<128x128xf32, #tpu.memory_space<vmem>>, vector<128x128xf32>
    %c0_2 = arith.constant 0 : index
    %c0_3 = arith.constant 0 : index
    %4 = vector.load %arg3[%c0_2, %c0_3] : memref<128x128xbf16, #tpu.memory_space<vmem>>, vector<128x128xbf16>
    %c0_4 = arith.constant 0 : index
    %c0_5 = arith.constant 0 : index
    %5 = vector.load %arg4[%c0_4, %c0_5] : memref<128x128xbf16, #tpu.memory_space<vmem>>, vector<128x128xbf16>
    %cst = arith.constant dense<0.000000e+00> : vector<128x128xf32>
    %6 = tpu.matmul %4, %5, %cst {dimension_numbers = #tpu.dot_dimension_numbers<[1], [0], [0], [1], [0, 0, 1, 1], [], []>} : vector<128x128xbf16>, vector<128x128xbf16>, vector<128x128xf32> -> vector<128x128xf32>
    %7 = arith.addf %3, %6 : vector<128x128xf32>
    %c0_6 = arith.constant 0 : index
    %c0_7 = arith.constant 0 : index
    %8 = vector.load %arg7[%c0_6, %c0_7] : memref<128x128xf32, #tpu.memory_space<vmem>>, vector<128x128xf32>
    tpu.vector_store %arg7[%c0_6, %c0_7], %7 {strides = array<i32>} : memref<128x128xf32, #tpu.memory_space<vmem>>, vector<128x128xf32>,
    %c0_i32_8 = arith.constant 0 : i32
    %9 = arith.cmpi eq, %arg2, %c0_i32_8 : i32
    %10 = arith.extui %9 : i1 to i32
    %c0_i32_9 = arith.constant 0 : i32
    %11 = arith.cmpi ne, %10, %c0_i32_9 : i32
    scf.if %11 {
      %c0_10 = arith.constant 0 : index
      %c0_11 = arith.constant 0 : index
      %12 = vector.load %arg7[%c0_10, %c0_11] : memref<128x128xf32, #tpu.memory_space<vmem>>, vector<128x128xf32>
      %c0_12 = arith.constant 0 : index
      %c0_13 = arith.constant 0 : index
      %13 = vector.load %arg5[%c0_12, %c0_13] : memref<1x128xf32, #tpu.memory_space<vmem>>, vector<1x128xf32>
      %14 = vector.broadcast %13 : vector<1x128xf32> to vector<128x128xf32>
      %15 = arith.addf %12, %14 : vector<128x128xf32>
      %cst_14 = arith.constant 0.000000e+00 : f32
      %16 = vector.broadcast %cst_14 : f32 to vector<128x128xf32>
      %17 = arith.maximumf %15, %16 : vector<128x128xf32>
      %18 = arith.truncf %17 : vector<128x128xf32> to vector<128x128xbf16>
      %c0_15 = arith.constant 0 : index
      %c0_16 = arith.constant 0 : index
      %19 = vector.load %arg6[%c0_15, %c0_16] : memref<128x128xbf16, #tpu.memory_space<vmem>>, vector<128x128xbf16>
      tpu.vector_store %arg6[%c0_15, %c0_16], %18 {strides = array<i32>} : memref<128x128xbf16, #tpu.memory_space<vmem>>, vector<128x128xbf16>,
    } else {
    }
    return
  }
  func.func @transform_0(%arg0: i32, %arg1: i32, %arg2: i32) -> (i32, i32) {
    %c0_i32 = arith.constant 0 : i32
    return %arg0, %arg2 : i32, i32
  }
  func.func @transform_1(%arg0: i32, %arg1: i32, %arg2: i32) -> (i32, i32) {
    %c0_i32 = arith.constant 0 : i32
    return %arg2, %arg1 : i32, i32
  }
  func.func @transform_2(%arg0: i32, %arg1: i32, %arg2: i32) -> (i32, i32) {
    %c0_i32 = arith.constant 0 : i32
    %c0_i32_0 = arith.constant 0 : i32
    return %c0_i32, %arg1 : i32, i32
  }
  func.func @transform_3(%arg0: i32, %arg1: i32, %arg2: i32) -> (i32, i32) {
    %c0_i32 = arith.constant 0 : i32
    return %arg0, %arg1 : i32, i32
  }
}

</mosaic_0001>

<bundles_post_ra>
// kernel: tpu_custom_call.1
= control target key start
LH: loop header
LB: loop body
LE: loop exit
PB: predicated region body
PF: predicated region fallthrough
CT: control target
= control target key end

     0   :  { %8 = vsyncpa [#allocation4], 0  ;;  %s786_s0 = inlined_call_operand.hbm [shape: bf16[128,128], index: 0, kind: input, shape index: {}]   ;;  %s787_s1 = inlined_call_operand.hbm [shape: bf16[128,128], index: 1, kind: input, shape index: {}]   ;;  %s788_s2 = inlined_call_operand.vmem [shape: f32[1,128], index: 2, kind: input, shape index: {}]   ;;  %s789_s3 = inlined_call_operand.hbm [shape: bf16[128,128], index: 3, kind: output, shape index: {}]  }
   0x1   :  { %9 = vsyncpa [#allocation7], 0 }
   0x2   :  { %10 = vsyncpa [#allocation5], 0  ;;  %s740_s12 = smov [#allocation3]  }
   0x3   :  { %s16_s13 = sshll.u32 %s740_s12, 4  ;;  %s17_s13 = int_to_ptr.vmem [resolvable:$true] %s16_s13 }
   0x4   :  { %s682_s14 = scalar_lea.vmem %s17_s13, 1024  ;;  %p687_p1 = scmp.lt.s32.totalorder %s17_s13, %s17_s13 }
   0x5   :  { %p683_p0 = scmp.ne.s32.totalorder %s17_s13, %s682_s14  ;;  %p688_p2 = scmp.lt.s32.totalorder %s682_s14, %s682_s14 }
   0x7   :  { %p689_p3 = por %p688_p2, %p687_p1 }
   0x9   :  { %p690_p4 = pnand %p689_p3, %p683_p0 }
   0xb   :  { %693 = shalt.err (!%p690_p4)
}
   0xc   :  { %s741_s15 = smov 64   ;;  %s742_s16 = smov 4  }
   0xd   :  { %22 = dma.hbm_to_vmem [thread:$0]  %s786_s0, 1024, %s17_s13, [#allocation4], %s741_s15, %s741_s15, %s742_s16  }
   0xe   :  { %s743_s19 = smov [#allocation6]  }
   0xf   :  { %s28_s20 = sshll.u32 %s743_s19, 4  ;;  %s29_s20 = int_to_ptr.vmem [resolvable:$true] %s28_s20 }
  0x10   :  { %s702_s21 = scalar_lea.vmem %s29_s20, 1024  ;;  %p707_p6 = scmp.lt.s32.totalorder %s29_s20, %s29_s20 }
  0x11   :  { %p703_p5 = scmp.ne.s32.totalorder %s29_s20, %s702_s21  ;;  %p708_p7 = scmp.lt.s32.totalorder %s702_s21, %s702_s21 }
  0x13   :  { %p709_p8 = por %p708_p7, %p707_p6 }
  0x15   :  { %p710_p9 = pnand %p709_p8, %p703_p5 }
  0x17   :  { %713 = shalt.err (!%p710_p9)
}
  0x18   :  { %34 = dma.hbm_to_vmem [thread:$0]  %s787_s1, 1024, %s29_s20, [#allocation7], %s741_s15, %s741_s15, %s742_s16  }
  0x19   :  { %734 = dma.done.wait [#allocation4], 1024  }
  0x1a   :  { %735 = vsyncadd [#allocation4], 4294966272 }
  0x1b   :  { %736 = dma.done.wait [#allocation7], 1024  }
  0x1c   :  { %737 = vsyncadd [#allocation7], 4294966272  ;;  %v658_v0 = vld [vmem:[#allocation6 + $0x38] sm:$0xff]   ;;  %v659_v1 = vld [vmem:[#allocation6 + $0x30] sm:$0xff]  }
  0x1d   :  { %605 = vmatprep.subr.bf16.mxu0 %v658_v0  ;;  %637 = vmatprep.subr.bf16.mxu1 %v658_v0  ;;  %v660_v2 = vld [vmem:[#allocation6 + $0x28] sm:$0xff]   ;;  %v661_v3 = vld [vmem:[#allocation6 + $0x20] sm:$0xff]   ;;  %v662_v6 = vld [vmem:[#allocation6 + $0x18] sm:$0xff]  }
  0x1e   :  { %606 = vmatpush3.bf16.msra.mxu0 %v658_v0  ;;  %645 = vmatpush3.bf16.msra.mxu1 %v658_v0  ;;  %v666_v4 = vld [vmem:[#allocation3] sm:$0xff]   ;;  %v663_v7 = vld [vmem:[#allocation6 + $0x10] sm:$0xff]   ;;  %v664_v8 = vld [vmem:[#allocation6 + $0x8] sm:$0xff]  }
  0x1f   :  { %607 = vmatprep.subr.bf16.mxu0 %v659_v1  ;;  %638 = vmatprep.subr.bf16.mxu1 %v659_v1  ;;  %v667_v5 = vld [vmem:[#allocation3 + $0x20] sm:$0xff]   ;;  %v668_v10 = vld [vmem:[#allocation3 + $0x8] sm:$0xff]   ;;  %v670_v12 = vld [vmem:[#allocation3 + $0x10] sm:$0xff]  }
  0x20   :  { %621 = vmatprep.mubr.bf16.mxu0 %v666_v4  ;;  %629 = vmatprep.mubr.bf16.mxu1 %v667_v5  ;;  %v665_v9 = vld [vmem:[#allocation6] sm:$0xff]   ;;  %v669_v11 = vld [vmem:[#allocation3 + $0x28] sm:$0xff]   ;;  %v671_v13 = vld [vmem:[#allocation3 + $0x30] sm:$0xff]  }
  0x21   :  { %v672_v14 = vld [vmem:[#allocation3 + $0x18] sm:$0xff]   ;;  %v509_v16 = vld [vmem:[%s788_s2] ss:$0 sm:$0xff]  ;;  %s744_s2 = smov [#allocation8]  }
  0x22   :  { %608 = vmatpush3.bf16.msra.mxu0 %v659_v1  ;;  %646 = vmatpush3.bf16.msra.mxu1 %v659_v1  ;;  %v673_v15 = vld [vmem:[#allocation3 + $0x38] sm:$0xff]   ;;  %s480_s24 = sshll.u32 %s744_s2, 4  ;;  %s481_s24 = int_to_ptr.vmem [resolvable:$true] %s480_s24 }
  0x23   :  { %609 = vmatprep.subr.bf16.mxu0 %v660_v2  ;;  %639 = vmatprep.subr.bf16.mxu1 %v660_v2  ;;  %s714_s25 = scalar_lea.vmem %s481_s24, 1024  ;;  %p719_p11 = scmp.lt.s32.totalorder %s481_s24, %s481_s24 }
  0x24   :  { %p715_p10 = scmp.ne.s32.totalorder %s481_s24, %s714_s25  ;;  %p720_p12 = scmp.lt.s32.totalorder %s714_s25, %s714_s25 }
  0x26   :  { %610 = vmatpush3.bf16.msra.mxu0 %v660_v2  ;;  %647 = vmatpush3.bf16.msra.mxu1 %v660_v2  ;;  %p721_p13 = por %p720_p12, %p719_p11 }
  0x27   :  { %611 = vmatprep.subr.bf16.mxu0 %v661_v3  ;;  %640 = vmatprep.subr.bf16.mxu1 %v661_v3 }
  0x28   :  { %p722_p0 = pnand %p721_p13, %p715_p10 }
  0x2a   :  { %612 = vmatpush3.bf16.msra.mxu0 %v661_v3  ;;  %648 = vmatpush3.bf16.msra.mxu1 %v661_v3 }
  0x2b   :  { %613 = vmatprep.subr.bf16.mxu0 %v662_v6  ;;  %641 = vmatprep.subr.bf16.mxu1 %v662_v6 }
  0x2e   :  { %614 = vmatpush3.bf16.msra.mxu0 %v662_v6  ;;  %649 = vmatpush3.bf16.msra.mxu1 %v662_v6 }
  0x2f   :  { %615 = vmatprep.subr.bf16.mxu0 %v663_v7  ;;  %642 = vmatprep.subr.bf16.mxu1 %v663_v7 }
  0x32   :  { %616 = vmatpush3.bf16.msra.mxu0 %v663_v7  ;;  %650 = vmatpush3.bf16.msra.mxu1 %v663_v7 }
  0x33   :  { %617 = vmatprep.subr.bf16.mxu0 %v664_v8  ;;  %643 = vmatprep.subr.bf16.mxu1 %v664_v8 }
  0x36   :  { %618 = vmatpush3.bf16.msra.mxu0 %v664_v8  ;;  %651 = vmatpush3.bf16.msra.mxu1 %v664_v8 }
  0x37   :  { %619 = vmatprep.subr.bf16.mxu0 %v665_v9  ;;  %644 = vmatprep.subr.bf16.mxu1 %v665_v9 }
  0x3a   :  { %620 = vmatpush3.bf16.msra.mxu0 %v665_v9  ;;  %652 = vmatpush3.bf16.msra.mxu1 %v665_v9 }
  0x3d   :  { %622 = vmatmul.mubr.bf16.vlgmr.msra.gmra.mxu0 %v668_v10  ;;  %630 = vmatmul.mubr.bf16.vlgmr.msra.gmra.mxu1 %v669_v11 }
  0x3e   :  { %625 = vmatprep.mubr.bf16.mxu0 %v670_v12  ;;  %633 = vmatprep.mubr.bf16.mxu1 %v671_v13 }
  0x45   :  { %626 = vmatmul.mubr.bf16.gmra.mxu0 %v672_v14  ;;  %634 = vmatmul.mubr.bf16.gmra.mxu1 %v673_v15 }
  0xfd   :  { %v623_v17 = vpop.f32.mrf.mxu0  ;;  %v631_v18 = vpop.f32.mrf.mxu1 }
  0xfe   :  { %v365_v19 = vadd.f32 %v623_v17, %v509_v16  ;;  %v373_v20 = vadd.f32 %v631_v18, %v509_v16 }
  0xff   :  { %v242_v21 = vpop.f32.mrf.mxu0  ;;  %v274_v22 = vpop.f32.mrf.mxu1 }
 0x100   :  { %v363_v23 = vadd.f32 %v509_v16, %v242_v21  ;;  %v371_v24 = vadd.f32 %v509_v16, %v274_v22  ;;  %v381_v29 = vmax.f32 %v365_v19, 0.0  ;;  %v389_v30 = vmax.f32 %v373_v20, 0.0 }
 0x101   :  { %v624_v25 = vpop.f32.mrf.mxu0  ;;  %v632_v26 = vpop.f32.mrf.mxu1 }
 0x102   :  { %v366_v27 = vadd.f32 %v624_v25, %v509_v16  ;;  %v374_v28 = vadd.f32 %v632_v26, %v509_v16  ;;  %v379_v37 = vmax.f32 %v363_v23, 0.0  ;;  %v387_v38 = vmax.f32 %v371_v24, 0.0 }
 0x103   :  { %v245_v31 = vpop.f32.mrf.mxu0  ;;  %v277_v32 = vpop.f32.mrf.mxu1 }
 0x104   :  { %v382_v33 = vmax.f32 %v366_v27, 0.0  ;;  %v390_v34 = vmax.f32 %v374_v28, 0.0  ;;  %v364_v35 = vadd.f32 %v509_v16, %v245_v31  ;;  %v372_v36 = vadd.f32 %v509_v16, %v277_v32 }
 0x105   :  { %v627_v39 = vpop.f32.mrf.mxu0  ;;  %v635_v40 = vpop.f32.mrf.mxu1 }
 0x106   :  { %v550_v41 = vpack.c.bf16 %v382_v33, %v381_v29  ;;  %v570_v42 = vpack.c.bf16 %v390_v34, %v389_v30  ;;  %v380_v43 = vmax.f32 %v364_v35, 0.0  ;;  %v388_v44 = vmax.f32 %v372_v36, 0.0 }
 0x107   :  { %v369_v45 = vadd.f32 %v627_v39, %v509_v16  ;;  %v377_v46 = vadd.f32 %v635_v40, %v509_v16  ;;  %v258_v47 = vpop.f32.mrf.mxu0  ;;  %v290_v48 = vpop.f32.mrf.mxu1 }
 0x108   :  { %582 = vst [vmem:[#allocation8 + $0x8] sm:$0xff] %v550_v41   ;;  %586 = vst [vmem:[#allocation8 + $0x28] sm:$0xff] %v570_v42   ;;  %v545_v49 = vpack.c.bf16 %v380_v43, %v379_v37  ;;  %v565_v50 = vpack.c.bf16 %v388_v44, %v387_v38  ;;  %v367_v51 = vadd.f32 %v509_v16, %v258_v47 }
 0x109   :  { %v375_v52 = vadd.f32 %v509_v16, %v290_v48  ;;  %v628_v53 = vpop.f32.mrf.mxu0  ;;  %v636_v54 = vpop.f32.mrf.mxu1  ;;  %v385_v57 = vmax.f32 %v369_v45, 0.0  ;;  %v393_v58 = vmax.f32 %v377_v46, 0.0 }
 0x10a   :  { %546 = vst [vmem:[#allocation8] sm:$0xff] %v545_v49   ;;  %585 = vst [vmem:[#allocation8 + $0x20] sm:$0xff] %v565_v50   ;;  %v370_v55 = vadd.f32 %v628_v53, %v509_v16  ;;  %v378_v56 = vadd.f32 %v636_v54, %v509_v16  ;;  %v383_v1 = vmax.f32 %v367_v51, 0.0 }
 0x10b   :  { %v261_v59 = vpop.f32.mrf.mxu0  ;;  %v293_v60 = vpop.f32.mrf.mxu1  ;;  %v391_v2 = vmax.f32 %v375_v52, 0.0 }
 0x10c   :  { %v386_v61 = vmax.f32 %v370_v55, 0.0  ;;  %v394_v62 = vmax.f32 %v378_v56, 0.0  ;;  %v368_v63 = vadd.f32 %v509_v16, %v261_v59  ;;  %v376_v0 = vadd.f32 %v509_v16, %v293_v60 }
 0x10e   :  { %v560_v3 = vpack.c.bf16 %v386_v61, %v385_v57  ;;  %v580_v4 = vpack.c.bf16 %v394_v62, %v393_v58  ;;  %v384_v5 = vmax.f32 %v368_v63, 0.0  ;;  %v392_v6 = vmax.f32 %v376_v0, 0.0 }
 0x110   :  { %584 = vst [vmem:[#allocation8 + $0x18] sm:$0xff] %v560_v3   ;;  %588 = vst [vmem:[#allocation8 + $0x38] sm:$0xff] %v580_v4   ;;  %v555_v7 = vpack.c.bf16 %v384_v5, %v383_v1  ;;  %v575_v8 = vpack.c.bf16 %v392_v6, %v391_v2 }
 0x112   :  { %583 = vst [vmem:[#allocation8 + $0x10] sm:$0xff] %v555_v7   ;;  %587 = vst [vmem:[#allocation8 + $0x30] sm:$0xff] %v575_v8  }
 0x113   :  { %725 = shalt.err (!%p722_p0)
}
 0x114   :  { %486 = dma.vmem_to_hbm [thread:$0]  %s481_s24, 1024, %s789_s3, [#allocation5], %s741_s15, %s741_s15, %s742_s16  }
 0x115   :  { %738 = dma.done.wait [#allocation5], 1024  }
 0x116   :  { %739 = vsyncadd [#allocation5], 4294966272 }
 0x117   :  { %490 = vsyncpa [#allocation4], 1 }
 0x118   :  { %491 = vsyncpa [#allocation7], 1 }
 0x119   :  { %492 = vsyncpa [#allocation5], 1 }

</bundles_post_ra>
